<compile_context>
chip_gen: v6e
topology: v6e:2x2x1
jax: 0.10.0
libtpu: 0.0.40
codegen_flags: <defaults>
</compile_context>

<pallas_src>
import jax
import jax.numpy as jnp
from jax.experimental import pallas as pl
from jax.experimental.pallas import tpu as pltpu

LEAKY_SLOPE = 0.01
BN_EPS = 1e-5
_TB_MAX = 4096  # batch-tile size on the lane axis (multiple of 128)


def _leaky_relu(x):
    return jnp.where(x > 0, x, LEAKY_SLOPE * x)


def _base_policy_kernel(xt_ref, w1_ref, b1_ref, w2_ref, b2_ref, w3_ref, b3_ref, o_ref):
    # xt_ref: (D, TB) tile of X^T (batch on lanes).  Weights are (out, in);
    # BatchNorm is already folded into w1/b1.  Each matmul accumulates in f32
    # on the MXU; bias add + leaky_relu run in f32 on the VPU.
    xt = xt_ref[...]                                              # (D, TB)

    h1 = jnp.dot(w1_ref[...], xt, preferred_element_type=jnp.float32) + b1_ref[...]
    h1 = _leaky_relu(h1)                                          # (H, TB) f32

    h2 = jnp.dot(w2_ref[...], h1.astype(w2_ref.dtype),
                 preferred_element_type=jnp.float32) + b2_ref[...]
    h2 = _leaky_relu(h2)                                          # (H, TB) f32

    out = jnp.dot(w3_ref[...], h2.astype(w3_ref.dtype),
                  preferred_element_type=jnp.float32) + b3_ref[...]
    o_ref[...] = _leaky_relu(out).astype(o_ref.dtype)             # (O, TB)


def base_policy_forward(x, w1, b1, w2, b2, w3, b3, *, compute_dtype=jnp.bfloat16):
    """x: (B, input_dim). w*: PyTorch-style (out, in). b*: (out,). Returns (B, out_dim) f32."""
    x = x.astype(jnp.float32)
    B, D = x.shape
    H = w1.shape[0]
    O = w3.shape[0]

    # Training-mode BatchNorm1d(affine=False): biased statistics over the FULL
    # batch, computed once here so batch tiling cannot change BN semantics,
    # then folded into fc1's weight and bias.
    mean = jnp.mean(x, axis=0)                                    # (D,)
    var = jnp.mean(jnp.square(x - mean[None, :]), axis=0)         # (D,) biased
    invstd = jax.lax.rsqrt(var + BN_EPS)
    w1f = w1.astype(jnp.float32) * invstd[None, :]                # (H, D)
    b1f = b1.astype(jnp.float32) - w1f @ mean                     # (H,)

    # Lane-dense layout: batch on the 128-wide lane axis (layout plumbing only).
    xt = x.T.astype(compute_dtype)                                # (D, B)
    w1c = w1f.astype(compute_dtype)
    w2c = w2.astype(compute_dtype)
    w3c = w3.astype(compute_dtype)
    b1c = b1f.reshape(H, 1)                                       # biases stay f32
    b2c = b2.astype(jnp.float32).reshape(H, 1)
    b3c = b3.astype(jnp.float32).reshape(O, 1)

    tb = B if B <= _TB_MAX else _TB_MAX
    grid = (pl.cdiv(B, tb),)

    def resident(shape):
        return pl.BlockSpec(shape, lambda i: (0,) * len(shape))

    in_specs = [
        pl.BlockSpec((D, tb), lambda i: (0, i)),   # X^T, streamed over batch
        resident((H, D)), resident((H, 1)),        # fc1 (BN-folded)
        resident((H, H)), resident((H, 1)),        # fc2
        resident((O, H)), resident((O, 1)),        # fc3
    ]
    out_specs = pl.BlockSpec((O, tb), lambda i: (0, i))

    itemsize = jnp.dtype(compute_dtype).itemsize
    cost = pl.CostEstimate(
        flops=2 * B * (D * H + H * H + H * O) + 4 * B * (2 * H + O),
        transcendentals=0,
        bytes_accessed=(B * D * itemsize                      # X^T in
                        + B * O * 4                           # out
                        + (D * H + H * H + H * O) * itemsize  # weights
                        + (2 * H + O) * 4),                   # biases
    )

    out_t = pl.pallas_call(
        _base_policy_kernel,
        out_shape=jax.ShapeDtypeStruct((O, B), jnp.float32),
        grid=grid,
        in_specs=in_specs,
        out_specs=out_specs,
        compiler_params=pltpu.CompilerParams(
            dimension_semantics=("parallel",),
            vmem_limit_bytes=32 * 1024 * 1024,
        ),
        cost_estimate=cost,
    )(xt, w1c, b1c, w2c, b2c, w3c, b3c)

    return out_t.T                                                # (B, out_dim)


def _ref_forward(x, w1, b1, w2, b2, w3, b3):
    mean = jnp.mean(x, axis=0, keepdims=True)
    var = jnp.mean((x - mean) ** 2, axis=0, keepdims=True)
    xn = (x - mean) / jnp.sqrt(var + BN_EPS)
    h1 = _leaky_relu(xn @ w1.T + b1)
    h2 = _leaky_relu(h1 @ w2.T + b2)
    return _leaky_relu(h2 @ w3.T + b3)


if __name__ == "__main__":
    # Small shapes consistent with the module: batch=8, input_dim=16,
    # hidden_dim=32, out_dim=8, onehot_dim=0 (default).
    B, IN_DIM, HID, OUT_DIM = 8, 16, 32, 8

    key = jax.random.PRNGKey(0)
    kx, k1, k2, k3, kb1, kb2, kb3 = jax.random.split(key, 7)

    x = jax.random.normal(kx, (B, IN_DIM), dtype=jnp.float32)

    def init_linear(kw, kb, fan_in, fan_out):
        bound = 1.0 / (fan_in ** 0.5)
        w = jax.random.uniform(kw, (fan_out, fan_in), jnp.float32, -bound, bound)
        b = jax.random.uniform(kb, (fan_out,), jnp.float32, -bound, bound)
        return w, b

    w1, b1 = init_linear(k1, kb1, IN_DIM, HID)
    w2, b2 = init_linear(k2, kb2, HID, HID)
    w3, b3 = init_linear(k3, kb3, HID, OUT_DIM)

    ref = _ref_forward(x, w1, b1, w2, b2, w3, b3)

    # Exact-precision path (f32 on the MXU) — strict check vs reference.
    out_f32 = jax.block_until_ready(
        base_policy_forward(x, w1, b1, w2, b2, w3, b3, compute_dtype=jnp.float32))
    assert out_f32.shape == (B, OUT_DIM)
    assert jnp.allclose(out_f32, ref, atol=1e-4, rtol=1e-4), "f32 mismatch vs reference"

    # Optimized default path (bf16 on the MXU, f32 accumulate) — loose check.
    out_bf16 = jax.block_until_ready(
        base_policy_forward(x, w1, b1, w2, b2, w3, b3))
    assert out_bf16.shape == (B, OUT_DIM)
    assert jnp.allclose(out_bf16, ref, atol=1e-1, rtol=1e-1), "bf16 mismatch vs reference"

    print("KERNEL_OK")
</pallas_src>

<mosaic_0001>
module attributes {stable_mosaic.version = 11 : i64} {
  func.func @_base_policy_kernel(%arg0: i32, %arg1: memref<16x8xf32, #tpu.memory_space<vmem>>, %arg2: memref<32x16xf32, #tpu.memory_space<vmem>>, %arg3: memref<32x1xf32, #tpu.memory_space<vmem>>, %arg4: memref<32x32xf32, #tpu.memory_space<vmem>>, %arg5: memref<32x1xf32, #tpu.memory_space<vmem>>, %arg6: memref<8x32xf32, #tpu.memory_space<vmem>>, %arg7: memref<8x1xf32, #tpu.memory_space<vmem>>, %arg8: memref<8x8xf32, #tpu.memory_space<vmem>>) attributes {dimension_semantics = [#tpu.dimension_semantics<parallel>], iteration_bounds = array<i64: 1>, scalar_prefetch = 0 : i64, scratch_operands = 0 : i64, tpu.core_type = #tpu.core_type<tc>, window_params = [{transform_indices = @transform_0, window_bounds = array<i64: 16, 8>}, {pipeline_mode = #tpu.pipeline_mode<synchronous>, transform_indices = @transform_1, window_bounds = array<i64: 32, 16>}, {pipeline_mode = #tpu.pipeline_mode<synchronous>, transform_indices = @transform_2, window_bounds = array<i64: 32, 1>}, {pipeline_mode = #tpu.pipeline_mode<synchronous>, transform_indices = @transform_3, window_bounds = array<i64: 32, 32>}, {pipeline_mode = #tpu.pipeline_mode<synchronous>, transform_indices = @transform_4, window_bounds = array<i64: 32, 1>}, {pipeline_mode = #tpu.pipeline_mode<synchronous>, transform_indices = @transform_5, window_bounds = array<i64: 8, 32>}, {pipeline_mode = #tpu.pipeline_mode<synchronous>, transform_indices = @transform_6, window_bounds = array<i64: 8, 1>}, {transform_indices = @transform_7, window_bounds = array<i64: 8, 8>}]} {
    %c0 = arith.constant 0 : index
    %c0_0 = arith.constant 0 : index
    %0 = vector.load %arg1[%c0, %c0_0] : memref<16x8xf32, #tpu.memory_space<vmem>>, vector<16x8xf32>
    %c0_1 = arith.constant 0 : index
    %c0_2 = arith.constant 0 : index
    %1 = vector.load %arg2[%c0_1, %c0_2] : memref<32x16xf32, #tpu.memory_space<vmem>>, vector<32x16xf32>
    %cst = arith.constant dense<0.000000e+00> : vector<32x8xf32>
    %2 = tpu.matmul %1, %0, %cst {dimension_numbers = #tpu.dot_dimension_numbers<[1], [0], [0], [1], [0, 0, 1, 1], [], []>} : vector<32x16xf32>, vector<16x8xf32>, vector<32x8xf32> -> vector<32x8xf32>
    %c0_3 = arith.constant 0 : index
    %c0_4 = arith.constant 0 : index
    %3 = vector.load %arg3[%c0_3, %c0_4] : memref<32x1xf32, #tpu.memory_space<vmem>>, vector<32x1xf32>
    %4 = vector.broadcast %3 : vector<32x1xf32> to vector<32x8xf32>
    %5 = arith.addf %2, %4 : vector<32x8xf32>
    %cst_5 = arith.constant 0.000000e+00 : f32
    %6 = vector.broadcast %cst_5 : f32 to vector<32x8xf32>
    %7 = arith.cmpf ogt, %5, %6 : vector<32x8xf32>
    %cst_6 = arith.constant 0.00999999977 : f32
    %8 = vector.broadcast %cst_6 : f32 to vector<32x8xf32>
    %9 = arith.mulf %8, %5 : vector<32x8xf32>
    %10 = arith.select %7, %5, %9 : vector<32x8xi1>, vector<32x8xf32>
    %c0_7 = arith.constant 0 : index
    %c0_8 = arith.constant 0 : index
    %11 = vector.load %arg4[%c0_7, %c0_8] : memref<32x32xf32, #tpu.memory_space<vmem>>, vector<32x32xf32>
    %cst_9 = arith.constant dense<0.000000e+00> : vector<32x8xf32>
    %12 = tpu.matmul %11, %10, %cst_9 {dimension_numbers = #tpu.dot_dimension_numbers<[1], [0], [0], [1], [0, 0, 1, 1], [], []>} : vector<32x32xf32>, vector<32x8xf32>, vector<32x8xf32> -> vector<32x8xf32>
    %c0_10 = arith.constant 0 : index
    %c0_11 = arith.constant 0 : index
    %13 = vector.load %arg5[%c0_10, %c0_11] : memref<32x1xf32, #tpu.memory_space<vmem>>, vector<32x1xf32>
    %14 = vector.broadcast %13 : vector<32x1xf32> to vector<32x8xf32>
    %15 = arith.addf %12, %14 : vector<32x8xf32>
    %cst_12 = arith.constant 0.000000e+00 : f32
    %16 = vector.broadcast %cst_12 : f32 to vector<32x8xf32>
    %17 = arith.cmpf ogt, %15, %16 : vector<32x8xf32>
    %cst_13 = arith.constant 0.00999999977 : f32
    %18 = vector.broadcast %cst_13 : f32 to vector<32x8xf32>
    %19 = arith.mulf %18, %15 : vector<32x8xf32>
    %20 = arith.select %17, %15, %19 : vector<32x8xi1>, vector<32x8xf32>
    %c0_14 = arith.constant 0 : index
    %c0_15 = arith.constant 0 : index
    %21 = vector.load %arg6[%c0_14, %c0_15] : memref<8x32xf32, #tpu.memory_space<vmem>>, vector<8x32xf32>
    %cst_16 = arith.constant dense<0.000000e+00> : vector<8x8xf32>
    %22 = tpu.matmul %21, %20, %cst_16 {dimension_numbers = #tpu.dot_dimension_numbers<[1], [0], [0], [1], [0, 0, 1, 1], [], []>} : vector<8x32xf32>, vector<32x8xf32>, vector<8x8xf32> -> vector<8x8xf32>
    %c0_17 = arith.constant 0 : index
    %c0_18 = arith.constant 0 : index
    %23 = vector.load %arg7[%c0_17, %c0_18] : memref<8x1xf32, #tpu.memory_space<vmem>>, vector<8x1xf32>
    %24 = vector.broadcast %23 : vector<8x1xf32> to vector<8x8xf32>
    %25 = arith.addf %22, %24 : vector<8x8xf32>
    %cst_19 = arith.constant 0.000000e+00 : f32
    %26 = vector.broadcast %cst_19 : f32 to vector<8x8xf32>
    %27 = arith.cmpf ogt, %25, %26 : vector<8x8xf32>
    %cst_20 = arith.constant 0.00999999977 : f32
    %28 = vector.broadcast %cst_20 : f32 to vector<8x8xf32>
    %29 = arith.mulf %28, %25 : vector<8x8xf32>
    %30 = arith.select %27, %25, %29 : vector<8x8xi1>, vector<8x8xf32>
    %c0_21 = arith.constant 0 : index
    %c0_22 = arith.constant 0 : index
    %31 = vector.load %arg8[%c0_21, %c0_22] : memref<8x8xf32, #tpu.memory_space<vmem>>, vector<8x8xf32>
    tpu.vector_store %arg8[%c0_21, %c0_22], %30 {strides = array<i32>} : memref<8x8xf32, #tpu.memory_space<vmem>>, vector<8x8xf32>,
    return
  }
  func.func @transform_0(%arg0: i32) -> (i32, i32) {
    %c0_i32 = arith.constant 0 : i32
    %c0_i32_0 = arith.constant 0 : i32
    return %c0_i32, %arg0 : i32, i32
  }
  func.func @transform_1(%arg0: i32) -> (i32, i32) {
    %c0_i32 = arith.constant 0 : i32
    %c0_i32_0 = arith.constant 0 : i32
    %c0_i32_1 = arith.constant 0 : i32
    return %c0_i32, %c0_i32_0 : i32, i32
  }
  func.func @transform_2(%arg0: i32) -> (i32, i32) {
    %c0_i32 = arith.constant 0 : i32
    %c0_i32_0 = arith.constant 0 : i32
    %c0_i32_1 = arith.constant 0 : i32
    return %c0_i32, %c0_i32_0 : i32, i32
  }
  func.func @transform_3(%arg0: i32) -> (i32, i32) {
    %c0_i32 = arith.constant 0 : i32
    %c0_i32_0 = arith.constant 0 : i32
    %c0_i32_1 = arith.constant 0 : i32
    return %c0_i32, %c0_i32_0 : i32, i32
  }
  func.func @transform_4(%arg0: i32) -> (i32, i32) {
    %c0_i32 = arith.constant 0 : i32
    %c0_i32_0 = arith.constant 0 : i32
    %c0_i32_1 = arith.constant 0 : i32
    return %c0_i32, %c0_i32_0 : i32, i32
  }
  func.func @transform_5(%arg0: i32) -> (i32, i32) {
    %c0_i32 = arith.constant 0 : i32
    %c0_i32_0 = arith.constant 0 : i32
    %c0_i32_1 = arith.constant 0 : i32
    return %c0_i32, %c0_i32_0 : i32, i32
  }
  func.func @transform_6(%arg0: i32) -> (i32, i32) {
    %c0_i32 = arith.constant 0 : i32
    %c0_i32_0 = arith.constant 0 : i32
    %c0_i32_1 = arith.constant 0 : i32
    return %c0_i32, %c0_i32_0 : i32, i32
  }
  func.func @transform_7(%arg0: i32) -> (i32, i32) {
    %c0_i32 = arith.constant 0 : i32
    %c0_i32_0 = arith.constant 0 : i32
    return %c0_i32, %arg0 : i32, i32
  }
}

</mosaic_0001>

<bundles_post_ra>
// kernel: tpu_custom_call.1
= control target key start
LH: loop header
LB: loop body
LE: loop exit
PB: predicated region body
PF: predicated region fallthrough
CT: control target
= control target key end

     0   :  { %vm57_vm0 = vcmask 130048   ;;  %v495_v4 = vmov 0   ;;  %s611_s0 = inlined_call_operand.vmem [shape: f32[16,8], index: 0, kind: input, shape index: {}]   ;;  %s612_s1 = inlined_call_operand.vmem [shape: f32[32,16], index: 1, kind: input, shape index: {}]   ;;  %s613_s2 = inlined_call_operand.vmem [shape: f32[32,1], index: 2, kind: input, shape index: {}]   ;;  %s614_s3 = inlined_call_operand.vmem [shape: f32[32,32], index: 3, kind: input, shape index: {}]   ;;  %s615_s4 = inlined_call_operand.vmem [shape: f32[32,1], index: 4, kind: input, shape index: {}]   ;;  %s616_s5 = inlined_call_operand.vmem [shape: f32[8,32], index: 5, kind: input, shape index: {}]   ;;  %s617_s6 = inlined_call_operand.vmem [shape: f32[8,1], index: 6, kind: input, shape index: {}]   ;;  %s618_s7 = inlined_call_operand.hbm [shape: f32[8,8], index: 7, kind: output, shape index: {}]  }
   0x1   :  { %v28_v0 = vld [vmem:[%s611_s0 + $0x8] sm:$0xff]  ;;  %v27_v1 = vld [vmem:[%s611_s0] sm:$0xff]  ;;  %471 = vset.pattern.permute.xlu0 %v495_v4  ;;  %v36_v5 = vld [vmem:[%s613_s2 + $0x18] sm:$0xff]  ;;  %472 = vset.pattern.permute.xlu1 %v495_v4 }
   0x2   :  { %v29_v2 = vld [vmem:[%s612_s1] sm:$0xff]  ;;  %432 = vmatprep.subr.mxu0 %v28_v0  ;;  %v30_v3 = vld [vmem:[%s612_s1 + $0x8] sm:$0xff]  ;;  %v31_v6 = vld [vmem:[%s612_s1 + $0x10] sm:$0xff]  ;;  %54 = vperm.xlu0 %471, %v36_v5  }
   0x3   :  { %436 = vmatprep.mubr.msk.f32.mxu0 %vm57_vm0, %v29_v2  ;;  %433 = vmatpush3.msra.mxu0 %v28_v0  ;;  %v34_v7 = vld [vmem:[%s613_s2 + $0x8] sm:$0xff]  ;;  %v35_v8 = vld [vmem:[%s613_s2 + $0x10] sm:$0xff] }
   0x4   :  { %434 = vmatprep.subr.mxu0 %v27_v1  ;;  %44 = vperm.xlu1 %472, %v34_v7  }
   0x5   :  { %435 = vmatpush3.msra.mxu0 %v27_v1 }
   0x6   :  { %437 = vmatmul.mubr.msk.f32.vlgmr.msra.gmra.mxu0 %vm57_vm0, %v30_v3 }
   0x7   :  { %12 = vsyncpa [#allocation3], 0  ;;  %439 = vmatprep.mubr.msk.f32.mxu0 %vm57_vm0, %v31_v6  ;;  %v32_v9 = vld [vmem:[%s612_s1 + $0x18] sm:$0xff]  ;;  %v33_v10 = vld [vmem:[%s613_s2] sm:$0xff]  ;;  %49 = vperm.xlu0 %471, %v35_v8   ;;  %vm195_vm1 = vcmask 261120   ;;  %v496_v40 = vmov 0.0  }
   0x8   :  { %v174_v11 = vld [vmem:[%s615_s4 + $0x18] sm:$0xff]  ;;  %39 = vperm.xlu1 %472, %v33_v10   ;;  %v173_v12 = vld [vmem:[%s615_s4 + $0x10] sm:$0xff]  ;;  %v172_v13 = vld [vmem:[%s615_s4 + $0x8] sm:$0xff]  ;;  %456 = vmatprep.subr.mxu0 %v496_v40  ;;  %vm497_vm6 = vmmov 0   ;;  %s498_s11 = smov [#allocation2]   ;;  %vm388_vm12 = vcmask 64512  }
   0x9   :  { %v171_v14 = vld [vmem:[%s615_s4] sm:$0xff]  ;;  %v168_v37 = vld [vmem:[%s614_s3 + $0x8] sm:$0xff]  ;;  %v169_v38 = vld [vmem:[%s614_s3 + $0x10] sm:$0xff]  ;;  %s396_s12 = sshll.u32 %s498_s11, 4  ;;  %s397_s12 = int_to_ptr.vmem [resolvable:$true] %s396_s12 }
   0xa   :  { %440 = vmatmul.mubr.msk.f32.gmra.mxu0 %vm57_vm0, %v32_v9  ;;  %v306_v15 = vld [vmem:[%s617_s6] sm:$0xff]  ;;  %v170_v39 = vld [vmem:[%s614_s3 + $0x18] sm:$0xff]  ;;  %s473_s13 = scalar_lea.vmem %s397_s12, 128  ;;  %p478_p1 = scmp.lt.s32.totalorder %s397_s12, %s397_s12 }
   0xb   :  { %192 = vperm.xlu0 %471, %v174_v11   ;;  %v167_v16 = vld [vmem:[%s614_s3] sm:$0xff]  ;;  %464 = vmatprep.mubr.msk.f32.mxu0 %vm497_vm6, %v496_v40  ;;  %p474_p0 = scmp.ne.s32.totalorder %s397_s12, %s473_s13  ;;  %p479_p2 = scmp.lt.s32.totalorder %s473_s13, %s473_s13 }
   0xc   :  { %187 = vperm.xlu1 %472, %v173_v12   ;;  %450 = vmatprep.mubr.msk.f32.mxu1 %vm195_vm1, %v167_v16  ;;  %v305_v60 = vld [vmem:[%s616_s5] sm:$0xff] }
   0xd   :  { %p480_p3 = por %p479_p2, %p478_p1 }
   0xf   :  { %182 = vperm.xlu0 %471, %v172_v13   ;;  %p481_p4 = pnand %p480_p3, %p474_p0 }
  0x10   :  { %177 = vperm.xlu1 %472, %v171_v14  }
  0x13   :  { %309 = vperm.xlu0 %471, %v306_v15  }
  0x7d   :  { %v55_v17 = vpop.permute.xlu0 %54 }
  0x7f   :  { %v45_v18 = vpop.permute.xlu1 %44 }
  0x82   :  { %v50_v22 = vpop.permute.xlu0 %49 }
  0x83   :  { %v40_v25 = vpop.permute.xlu1 %39 }
  0x86   :  { %v193_v41 = vpop.permute.xlu0 %192 }
  0x87   :  { %v188_v42 = vpop.permute.xlu1 %187 }
  0x8a   :  { %v183_v45 = vpop.permute.xlu0 %182 }
  0x8b   :  { %v178_v49 = vpop.permute.xlu1 %177 }
  0x8e   :  { %v310_v62 = vpop.permute.xlu0 %309 }
  0xc6   :  { %v438_v19 = vpop.f32.mrf.mxu0 }
  0xc7   :  { %v142_v23 = vadd.f32 %v438_v19, %v45_v18 }
  0xc8   :  { %v136_v20 = vpop.f32.mrf.mxu0 }
  0xc9   :  { %v137_v27 = vadd.f32 %v136_v20, %v40_v25  ;;  %v160_v30 = vmul.f32 0.01, %v142_v23  ;;  %vm156_vm4 = vcmp.gt.f32.partialorder %v142_v23, 0.0 }
  0xca   :  { %v441_v21 = vpop.f32.mrf.mxu0 }
  0xcb   :  { %v152_v24 = vadd.f32 %v441_v21, %v55_v17  ;;  %v159_v33 = vmul.f32 0.01, %v137_v27  ;;  %vm155_vm5 = vcmp.gt.f32.partialorder %v137_v27, 0.0  ;;  %v164_v35 = vsel %vm156_vm4, %v142_v23, %v160_v30 }
  0xcc   :  { %v146_v26 = vpop.f32.mrf.mxu0 }
  0xcd   :  { %v147_v28 = vadd.f32 %v146_v26, %v50_v22  ;;  %vm158_vm2 = vcmp.gt.f32.partialorder %v152_v24, 0.0  ;;  %v162_v29 = vmul.f32 0.01, %v152_v24  ;;  %v163_v36 = vsel %vm155_vm5, %v137_v27, %v159_v33 }
  0xcf   :  { %v161_v31 = vmul.f32 0.01, %v147_v28  ;;  %v166_v32 = vsel %vm158_vm2, %v152_v24, %v162_v29  ;;  %vm157_vm3 = vcmp.gt.f32.partialorder %v147_v28, 0.0 }
  0xd0   :  { %442 = vmatprep.subr.mxu1 %v166_v32 }
  0xd1   :  { %443 = vmatpush3.msra.mxu1 %v166_v32  ;;  %v165_v34 = vsel %vm157_vm3, %v147_v28, %v161_v31 }
  0xd2   :  { %444 = vmatprep.subr.mxu1 %v165_v34 }
  0xd3   :  { %445 = vmatpush3.msra.mxu1 %v165_v34 }
  0xd4   :  { %446 = vmatprep.subr.mxu1 %v164_v35 }
  0xd5   :  { %447 = vmatpush3.msra.mxu1 %v164_v35 }
  0xd6   :  { %448 = vmatprep.subr.mxu1 %v163_v36 }
  0xd7   :  { %449 = vmatpush3.msra.mxu1 %v163_v36 }
  0xd8   :  { %451 = vmatmul.mubr.msk.f32.vlgmr.msra.gmra.mxu1 %vm195_vm1, %v168_v37 }
  0xd9   :  { %453 = vmatprep.mubr.msk.f32.mxu1 %vm195_vm1, %v169_v38 }
  0xdc   :  { %454 = vmatmul.mubr.msk.f32.gmra.mxu1 %vm195_vm1, %v170_v39 }
 0x198   :  { %v452_v43 = vpop.f32.mrf.mxu1 }
 0x199   :  { %v280_v47 = vadd.f32 %v452_v43, %v183_v45 }
 0x19a   :  { %v274_v44 = vpop.f32.mrf.mxu1 }
 0x19b   :  { %v275_v51 = vadd.f32 %v274_v44, %v178_v49  ;;  %v298_v54 = vmul.f32 0.01, %v280_v47  ;;  %vm294_vm9 = vcmp.gt.f32.partialorder %v280_v47, 0.0 }
 0x19c   :  { %v455_v46 = vpop.f32.mrf.mxu1 }
 0x19d   :  { %v290_v48 = vadd.f32 %v455_v46, %v193_v41  ;;  %v297_v57 = vmul.f32 0.01, %v275_v51  ;;  %vm293_vm10 = vcmp.gt.f32.partialorder %v275_v51, 0.0  ;;  %v302_v59 = vsel %vm294_vm9, %v280_v47, %v298_v54 }
 0x19e   :  { %v284_v50 = vpop.f32.mrf.mxu1 }
 0x19f   :  { %vm296_vm7 = vcmp.gt.f32.partialorder %v290_v48, 0.0  ;;  %v300_v52 = vmul.f32 0.01, %v290_v48  ;;  %v285_v53 = vadd.f32 %v284_v50, %v188_v42  ;;  %v301_v61 = vsel %vm293_vm10, %v275_v51, %v297_v57 }
 0x1a1   :  { %vm295_vm8 = vcmp.gt.f32.partialorder %v285_v53, 0.0  ;;  %v299_v55 = vmul.f32 0.01, %v285_v53  ;;  %v304_v56 = vsel %vm296_vm7, %v290_v48, %v300_v52 }
 0x1a2   :  { %457 = vmatpush3.msra.mxu0 %v304_v56 }
 0x1a3   :  { %458 = vmatprep.subr.mxu0 %v496_v40  ;;  %v303_v58 = vsel %vm295_vm8, %v285_v53, %v299_v55 }
 0x1a4   :  { %459 = vmatpush3.msra.mxu0 %v303_v58 }
 0x1a5   :  { %460 = vmatprep.subr.mxu0 %v496_v40 }
 0x1a6   :  { %461 = vmatpush3.msra.mxu0 %v302_v59 }
 0x1a7   :  { %462 = vmatprep.subr.mxu0 %v496_v40 }
 0x1a8   :  { %463 = vmatpush3.msra.mxu0 %v301_v61 }
 0x1a9   :  { %465 = vmatmul.mubr.msk.f32.vlgmr.msra.gmra.mxu0 %vm195_vm1, %v305_v60 }
 0x269   :  { %v381_v63 = vpop.f32.mrf.mxu0 }
 0x26a   :  { %v382_v0 = vadd.f32 %v381_v63, %v310_v62 }
 0x26b   :  { %v466_v1 = vpop.f32.mrf.mxu0 }
 0x26c   :  { %v386_v2 = vmul.f32 0.01, %v382_v0  ;;  %vm385_vm11 = vcmp.gt.f32.partialorder %v382_v0, 0.0 }
 0x26e   :  { %v387_v3 = vsel %vm385_vm11, %v382_v0, %v386_v2 }
 0x26f   :  { %389 = vst.msk [vmem:[#allocation2] sm:$0xff] %vm388_vm12, %v387_v3 }
 0x270   :  { %484 = shalt.err (!%p481_p4)
}
 0x271   :  { %399 = dma.vmem_to_hbm [thread:$0]  %s397_s12, 128, %s618_s7, [#allocation3]  }
 0x272   :  { %493 = dma.done.wait [#allocation3], 128  }
 0x273   :  { %494 = vsyncadd [#allocation3], 4294967168 }
 0x274   :  { %403 = vsyncpa [#allocation3], 1 }

</bundles_post_ra>
